<compile_context>
chip_gen: v7x
topology: tpu7x:2x2x1
jax: 0.10.0
libtpu: 0.0.40
codegen_flags: <defaults>
</compile_context>

<pallas_src>
import functools

import jax
import jax.numpy as jnp
from jax.experimental import pallas as pl
from jax.experimental.pallas import tpu as pltpu

BN_EPS = 1e-5
LANE = 128


def _round_up(x, m):
    return (x + m - 1) // m * m


# ---------------------------------------------------------------------------
# Host-side, one-time parameter preprocessing (fold BN, transpose, cast, pack)
# ---------------------------------------------------------------------------
def prepare_params(params, out_layer, matmul_dtype=jnp.bfloat16):
    wts = []
    rows = []
    layer_dims = []
    for lp in params["layers"]:
        w = lp["weight"]                                           # (Dout, Din)
        scale = lp["gamma"] * jax.lax.rsqrt(lp["running_var"] + BN_EPS)
        w_folded = w * scale[:, None]                              # fold BN scale
        b_folded = (lp["bias"] - lp["running_mean"]) * scale + lp["beta"]
        wts.append(jnp.asarray(w_folded.T, dtype=matmul_dtype))    # (Din, Dout)
        rows.append(jnp.asarray(b_folded, dtype=jnp.float32))
        layer_dims.append((int(w.shape[1]), int(w.shape[0])))
    if out_layer:
        rows.append(jnp.asarray(params["out"]["weight"].reshape(-1), jnp.float32))
        rows.append(jnp.asarray(params["out"]["bias"].reshape(-1), jnp.float32))
    dmax = _round_up(max(r.shape[0] for r in rows), LANE)
    packed = jnp.stack([jnp.pad(r, (0, dmax - r.shape[0])) for r in rows])
    return tuple(wts), packed, tuple(layer_dims)


# ---------------------------------------------------------------------------
# Kernel
# ---------------------------------------------------------------------------
def _make_mlp_kernel(layer_dims, out_layer):
    n_layers = len(layer_dims)

    def kernel(x_ref, *refs):
        wt_refs = refs[:n_layers]
        rows_ref = refs[n_layers]
        out_ref = refs[n_layers + 1]

        rows = rows_ref[...]                          # (n_rows, dmax)  f32
        h = x_ref[...]                                # (TM, D0)        f32
        for l, (_din, dout) in enumerate(layer_dims):
            wt = wt_refs[l][...]                      # (Din, Dout)     bf16
            acc = jnp.dot(h.astype(wt.dtype), wt,     # MXU, f32 accumulate
                          preferred_element_type=jnp.float32)
            b = rows[l:l + 1, :dout]                  # folded Linear+BN bias
            h = jnp.maximum(acc + b, 0.0)             # ReLU (Dropout: identity in eval)
        if out_layer:
            d_last = layer_dims[-1][1]
            w_out = rows[n_layers:n_layers + 1, :d_last]       # (1, D_last)
            b_out = rows[n_layers + 1:n_layers + 2, :1]        # (1, 1)
            out_ref[...] = jnp.sum(h * w_out, axis=-1, keepdims=True) + b_out
        else:
            out_ref[...] = h

    return kernel


@functools.partial(jax.jit, static_argnames=("layer_dims", "out_layer", "tm"))
def mlp_forward(x, wts, rows, *, layer_dims, out_layer, tm=128):
    B, d0 = x.shape
    assert d0 == layer_dims[0][0]
    d_out = 1 if out_layer else layer_dims[-1][1]
    tm = min(tm, B)
    grid = (pl.cdiv(B, tm),)

    in_specs = [pl.BlockSpec((tm, d0), lambda i: (i, 0))]            # activations: tiled
    for (din, dout) in layer_dims:                                   # weights: VMEM-resident
        in_specs.append(pl.BlockSpec((din, dout), lambda i: (0, 0)))
    in_specs.append(pl.BlockSpec(rows.shape, lambda i: (0, 0)))      # packed row params

    return pl.pallas_call(
        _make_mlp_kernel(layer_dims, out_layer),
        out_shape=jax.ShapeDtypeStruct((B, d_out), jnp.float32),
        grid=grid,
        in_specs=in_specs,
        out_specs=pl.BlockSpec((tm, d_out), lambda i: (i, 0)),
        compiler_params=pltpu.CompilerParams(
            dimension_semantics=("parallel",)),
    )(x, *wts, rows)


# ---------------------------------------------------------------------------
# Pure-JAX reference (f32) for correctness checking
# ---------------------------------------------------------------------------
def reference_forward(x, params, out_layer):
    h = x
    for lp in params["layers"]:
        h = h @ lp["weight"].T + lp["bias"]
        inv = jax.lax.rsqrt(lp["running_var"] + BN_EPS)
        h = (h - lp["running_mean"]) * inv * lp["gamma"] + lp["beta"]
        h = jnp.maximum(h, 0.0)
        # Dropout: identity in eval
    if out_layer:
        h = h @ params["out"]["weight"].T + params["out"]["bias"]
    return h


def _init_params(key, input_dim, embed_dims, out_layer):
    params = {"layers": []}
    d_in = input_dim
    for d_out in embed_dims:
        key, kw, kb, km, kv, kg, kbe = jax.random.split(key, 7)
        bound = 1.0 / jnp.sqrt(jnp.float32(d_in))
        params["layers"].append({
            "weight": jax.random.uniform(kw, (d_out, d_in), minval=-bound,
                                         maxval=bound, dtype=jnp.float32),
            "bias": jax.random.uniform(kb, (d_out,), minval=-bound,
                                       maxval=bound, dtype=jnp.float32),
            "gamma": jax.random.uniform(kg, (d_out,), minval=0.8, maxval=1.2,
                                        dtype=jnp.float32),
            "beta": 0.1 * jax.random.normal(kbe, (d_out,), dtype=jnp.float32),
            "running_mean": 0.1 * jax.random.normal(km, (d_out,), dtype=jnp.float32),
            "running_var": jax.random.uniform(kv, (d_out,), minval=0.5,
                                              maxval=1.5, dtype=jnp.float32),
        })
        d_in = d_out
    if out_layer:
        key, kw, kb = jax.random.split(key, 3)
        bound = 1.0 / jnp.sqrt(jnp.float32(d_in))
        params["out"] = {
            "weight": jax.random.uniform(kw, (1, d_in), minval=-bound,
                                         maxval=bound, dtype=jnp.float32),
            "bias": jax.random.uniform(kb, (1,), minval=-bound, maxval=bound,
                                       dtype=jnp.float32),
        }
    return params


if __name__ == "__main__":
    # MLP(input_dim=128, embed_dims=(128, 64), dropout=0.2)
    batch, input_dim = 256, 128
    embed_dims = (128, 64)
    dropout = 0.2                       # identity in eval mode

    key = jax.random.PRNGKey(0)
    kx, kp = jax.random.split(key)
    x = jax.random.normal(kx, (batch, input_dim), dtype=jnp.float32)

    all_ok = True
    for out_layer in (True, False):
        params = _init_params(kp, input_dim, embed_dims, out_layer)
        wts, rows, layer_dims = prepare_params(params, out_layer)     # one-time prep
        out = mlp_forward(x, wts, rows, layer_dims=layer_dims,
                          out_layer=out_layer, tm=128)
        out = jax.block_until_ready(out)
        ref = reference_forward(x, params, out_layer)
        assert out.shape == ref.shape
        all_ok &= bool(jnp.allclose(out, ref, atol=3e-2, rtol=3e-2))

    assert all_ok, "mismatch vs reference"
    print("KERNEL_OK")
</pallas_src>

<mosaic_0001>
module attributes {stable_mosaic.version = 11 : i64} {
  func.func @kernel(%arg0: i32, %arg1: memref<128x128xf32, #tpu.memory_space<vmem>>, %arg2: memref<128x128xbf16, #tpu.memory_space<vmem>>, %arg3: memref<128x64xbf16, #tpu.memory_space<vmem>>, %arg4: memref<4x128xf32, #tpu.memory_space<vmem>>, %arg5: memref<128x1xf32, #tpu.memory_space<vmem>>) attributes {dimension_semantics = [#tpu.dimension_semantics<parallel>], iteration_bounds = array<i64: 2>, scalar_prefetch = 0 : i64, scratch_operands = 0 : i64, tpu.core_type = #tpu.core_type<tc>, window_params = [{transform_indices = @transform_0, window_bounds = array<i64: 128, 128>}, {pipeline_mode = #tpu.pipeline_mode<synchronous>, transform_indices = @transform_1, window_bounds = array<i64: 128, 128>}, {pipeline_mode = #tpu.pipeline_mode<synchronous>, transform_indices = @transform_2, window_bounds = array<i64: 128, 64>}, {pipeline_mode = #tpu.pipeline_mode<synchronous>, transform_indices = @transform_3, window_bounds = array<i64: 4, 128>}, {transform_indices = @transform_4, window_bounds = array<i64: 128, 1>}]} {
    %c0 = arith.constant 0 : index
    %c0_0 = arith.constant 0 : index
    %0 = vector.load %arg4[%c0, %c0_0] : memref<4x128xf32, #tpu.memory_space<vmem>>, vector<4x128xf32>
    %c0_1 = arith.constant 0 : index
    %c0_2 = arith.constant 0 : index
    %1 = vector.load %arg1[%c0_1, %c0_2] : memref<128x128xf32, #tpu.memory_space<vmem>>, vector<128x128xf32>
    %c0_3 = arith.constant 0 : index
    %c0_4 = arith.constant 0 : index
    %2 = vector.load %arg2[%c0_3, %c0_4] : memref<128x128xbf16, #tpu.memory_space<vmem>>, vector<128x128xbf16>
    %3 = arith.truncf %1 : vector<128x128xf32> to vector<128x128xbf16>
    %cst = arith.constant dense<0.000000e+00> : vector<128x128xf32>
    %4 = tpu.matmul %3, %2, %cst {dimension_numbers = #tpu.dot_dimension_numbers<[1], [0], [0], [1], [0, 0, 1, 1], [], []>} : vector<128x128xbf16>, vector<128x128xbf16>, vector<128x128xf32> -> vector<128x128xf32>
    %5 = vector.extract_strided_slice %0 {offsets = [0, 0], sizes = [1, 128], strides = [1, 1]} : vector<4x128xf32> to vector<1x128xf32>
    %6 = vector.broadcast %5 : vector<1x128xf32> to vector<128x128xf32>
    %7 = arith.addf %4, %6 : vector<128x128xf32>
    %cst_5 = arith.constant 0.000000e+00 : f32
    %8 = vector.broadcast %cst_5 : f32 to vector<128x128xf32>
    %9 = arith.maximumf %7, %8 : vector<128x128xf32>
    %c0_6 = arith.constant 0 : index
    %c0_7 = arith.constant 0 : index
    %10 = vector.load %arg3[%c0_6, %c0_7] : memref<128x64xbf16, #tpu.memory_space<vmem>>, vector<128x64xbf16>
    %11 = arith.truncf %9 : vector<128x128xf32> to vector<128x128xbf16>
    %cst_8 = arith.constant dense<0.000000e+00> : vector<128x64xf32>
    %12 = tpu.matmul %11, %10, %cst_8 {dimension_numbers = #tpu.dot_dimension_numbers<[1], [0], [0], [1], [0, 0, 1, 1], [], []>} : vector<128x128xbf16>, vector<128x64xbf16>, vector<128x64xf32> -> vector<128x64xf32>
    %13 = vector.extract_strided_slice %0 {offsets = [1, 0], sizes = [1, 64], strides = [1, 1]} : vector<4x128xf32> to vector<1x64xf32>
    %14 = vector.broadcast %13 : vector<1x64xf32> to vector<128x64xf32>
    %15 = arith.addf %12, %14 : vector<128x64xf32>
    %cst_9 = arith.constant 0.000000e+00 : f32
    %16 = vector.broadcast %cst_9 : f32 to vector<128x64xf32>
    %17 = arith.maximumf %15, %16 : vector<128x64xf32>
    %18 = vector.extract_strided_slice %0 {offsets = [2, 0], sizes = [1, 64], strides = [1, 1]} : vector<4x128xf32> to vector<1x64xf32>
    %19 = vector.extract_strided_slice %0 {offsets = [3, 0], sizes = [1, 1], strides = [1, 1]} : vector<4x128xf32> to vector<1x1xf32>
    %20 = vector.broadcast %18 : vector<1x64xf32> to vector<128x64xf32>
    %21 = arith.mulf %17, %20 : vector<128x64xf32>
    %cst_10 = arith.constant dense<0.000000e+00> : vector<128xf32>
    %22 = vector.multi_reduction <add>, %21, %cst_10 [1] : vector<128x64xf32> to vector<128xf32>
    %23 = vector.shape_cast %22 : vector<128xf32> to vector<128x1xf32>
    %24 = vector.broadcast %19 : vector<1x1xf32> to vector<128x1xf32>
    %25 = arith.addf %23, %24 : vector<128x1xf32>
    %c0_11 = arith.constant 0 : index
    %c0_12 = arith.constant 0 : index
    %26 = vector.load %arg5[%c0_11, %c0_12] : memref<128x1xf32, #tpu.memory_space<vmem>>, vector<128x1xf32>
    tpu.vector_store %arg5[%c0_11, %c0_12], %25 {strides = array<i32>} : memref<128x1xf32, #tpu.memory_space<vmem>>, vector<128x1xf32>,
    return
  }
  func.func @transform_0(%arg0: i32) -> (i32, i32) {
    %c0_i32 = arith.constant 0 : i32
    %c0_i32_0 = arith.constant 0 : i32
    return %arg0, %c0_i32 : i32, i32
  }
  func.func @transform_1(%arg0: i32) -> (i32, i32) {
    %c0_i32 = arith.constant 0 : i32
    %c0_i32_0 = arith.constant 0 : i32
    %c0_i32_1 = arith.constant 0 : i32
    return %c0_i32, %c0_i32_0 : i32, i32
  }
  func.func @transform_2(%arg0: i32) -> (i32, i32) {
    %c0_i32 = arith.constant 0 : i32
    %c0_i32_0 = arith.constant 0 : i32
    %c0_i32_1 = arith.constant 0 : i32
    return %c0_i32, %c0_i32_0 : i32, i32
  }
  func.func @transform_3(%arg0: i32) -> (i32, i32) {
    %c0_i32 = arith.constant 0 : i32
    %c0_i32_0 = arith.constant 0 : i32
    %c0_i32_1 = arith.constant 0 : i32
    return %c0_i32, %c0_i32_0 : i32, i32
  }
  func.func @transform_4(%arg0: i32) -> (i32, i32) {
    %c0_i32 = arith.constant 0 : i32
    %c0_i32_0 = arith.constant 0 : i32
    return %arg0, %c0_i32 : i32, i32
  }
}

</mosaic_0001>

<bundles_post_ra>
// kernel: mlp_forward.1
= control target key start
LH: loop header
LB: loop body
LE: loop exit
PB: predicated region body
PF: predicated region fallthrough
CT: control target
= control target key end

     0   :  { %9 = vsyncpa [#allocation3], 0  ;;  %s1340_s0 = inlined_call_operand.hbm [shape: f32[256,128], index: 0, kind: input, shape index: {}]   ;;  %s1341_s1 = inlined_call_operand.vmem [shape: bf16[128,128], index: 1, kind: input, shape index: {}]   ;;  %s1342_s2 = inlined_call_operand.vmem [shape: bf16[128,64], index: 2, kind: input, shape index: {}]   ;;  %s1343_s3 = inlined_call_operand.vmem [shape: f32[4,128], index: 3, kind: input, shape index: {}]   ;;  %s1344_s4 = inlined_call_operand.vmem [shape: f32[256,1], index: 4, kind: output, shape index: {}]  }
   0x1   :  { %11 = vsyncpa [#allocation3 + $0x1], 0  ;;  %s1066_s15 = smov 0   ;;  %s1068_s16 = smov 0  }
   0x2   :  { %s1070_s17 = smov 0   ;;  %s1072_s18 = smov 0  }
   0x3 LB: > { %s789_s19 = sadd.s32 4294967295, %s1036_s18   ;;  %s1086_s20 = sadd.s32 1, %s1036_s18   ;;  %s1036_s18 = sphi %s1072_s18, %s1351_s18   ;;  %s1032_s17 = sphi %s1070_s17, %s1350_s17   ;;  %s1028_s16 = sphi %s1068_s16, %s1349_s16   ;;  %s1024_s15 = sphi %s1066_s15, %s1348_s15  }
   0x4   : > { %s21_s21 = ssub.s32 %s1036_s18, %s1086_s20  ;;  %s24_s22 = sadd.s32 1, %s1032_s17 }
   0x5   : > { %p22_p0 = scmp.eq.s32.totalorder %s21_s21, 0  ;;  %p31_p1 = scmp.ne.s32.totalorder %s1032_s17, %s1028_s16 }
   0x6   : > { %p32_p2 = scmp.eq.s32.totalorder %s1036_s18, 0  ;;  %p37_p3 = scmp.ne.s32.totalorder %s1028_s16, %s1024_s15 }
   0x7   : > { %s1096_s23 = scalar_select %p22_p0, %s1032_s17, %s24_s22  }
   0x8   : > { %p33_p4 = por %p32_p2, %p31_p1  ;;  %p38_p5 = scmp.eq.s32.totalorder %s789_s19, 0 }
   0x9   : > { %p921_p6 = scmp.lt.s32.totalorder %s1036_s18, 2  ;;  %s159_s25 = sand.u32 1, %s1032_s17  }
   0xa   : > { %p1101_p7 = por %p38_p5, %p37_p3  ;;  %s793_s26 = sshll.u32 %s159_s25, 7 }
   0xb   : > { %s818_s27 = sshll.u32 %s1036_s18, 11  ;;  %s163_s5 = scalar_lea.vmem [#allocation2], %s793_s26 }
   0xc   : > { %s1110_s30 = scalar_lea.hbm %s1340_s0, %s818_s27  ;;  %s170_s6 = sshll.u32 %s163_s5, 4  ;;  %s1112_s6 = int_to_ptr.vmem [resolvable:$true] %s170_s6 }
   0xd   : > { %p1114_p8 = pnand %p921_p6, %p33_p4  ;;  %s1119_s8 = scalar_lea.sflag [#allocation3], %s159_s25 }
   0xe   : > { %s972_s9 = scalar_lea.hbm %s1110_s30, 2048  ;;  %s977_s12 = scalar_lea.hbm %s1340_s0, 4096 }
   0xf   : > { %p973_p10 = scmp.ne.s32.totalorder %s1110_s30, %s972_s9  ;;  %p974_p11 = pneg %p1114_p8 }
  0x10   : > { %p978_p0 = scmp.lt.u32.totalorder %s1110_s30, %s1340_s0  ;;  %p979_p1 = scmp.lt.u32.totalorder %s977_s12, %s972_s9 }
  0x11   : > { %p975_p12 = pnand %p974_p11, %p973_p10  ;;  %p981_p3 = scmp.lt.u32.totalorder %s972_s9, %s1110_s30 }
  0x12   : > { %p980_p2 = por %p979_p1, %p978_p0 }
  0x13   : > { %p976_p13 = pneg %p975_p12 }
  0x14   : > { %p982_p4 = por %p981_p3, %p980_p2 }
  0x16   : > { %p983_p5 = pnand %p982_p4, %p976_p13 }
  0x18   : > { %986 = shalt.err (!%p983_p5)
}
  0x19   : > { %s987_s15 = scalar_lea.vmem %s1112_s6, 2048  ;;  %s1038_s21 = smov [#allocation2]  }
  0x1a   : > { %p988_p6 = scmp.ne.s32.totalorder %s1112_s6, %s987_s15  ;;  %s992_s22 = sshll.u32 %s1038_s21, 4  ;;  %s993_s22 = int_to_ptr.vmem [resolvable:$false] %s992_s22 }
  0x1b   : > { %s994_s25 = scalar_lea.vmem %s993_s22, 4096  ;;  %p995_p9 = scmp.lt.s32.totalorder %s1112_s6, %s993_s22 }
  0x1c   : > { %p990_p10 = pnand %p988_p6, %p974_p11  ;;  %p996_p0 = scmp.lt.s32.totalorder %s994_s25, %s987_s15 }
  0x1e   : > { %p991_p12 = pneg %p990_p10  ;;  %p997_p1 = por %p996_p0, %p995_p9 }
  0x20   : > { %p998_p2 = pnand %p997_p1, %p991_p12 }
  0x22   : > { %1001 = shalt.err (!%p998_p2)
}
  0x23   : > { %s1039_s26 = smov 128   ;;  %s1040_s27 = smov 8  }
  0x24   : > { %920 = dma.hbm_to_vmem [thread:$0]  (!%p1114_p8), %s1110_s30, 2048, %s1112_s6, %s1119_s8, %s1039_s26, %s1039_s26, %s1040_s27  }
  0x25   : > { %p178_p11 = scmp.lt.s32.totalorder %s1036_s18, 3  ;;  %p1347_p13 = scmp.ge.s32.totalorder %s1036_s18, 1 }
  0x27   : > { %p179_p3 = pnand %p1347_p13, %p178_p11 }
  0x28   : > { %s184_s28 = sand.u32 (!%p179_p3), 1, %s1028_s16  }
  0x29   : > { %182 = sbr.rel (%p179_p3) target bundleno = 699 (0x2bb), region = 36  ;;  %s797_s29 = sshll.u32 (!%p179_p3), %s184_s28, 7 }
  0x2a   : > { %s185_s5 = scalar_lea.sflag (!%p179_p3), [#allocation3], %s184_s28  ;;  %s1151_s9 = scalar_lea.vmem (!%p179_p3), [#allocation2], %s797_s29 }
  0x30   : > { %1019 = dma.done.wait (%p1101_p7), %s185_s5, 2048  }
  0x31   : > { %1021 = vsyncadd (%p1101_p7), %s185_s5, 4294965248  ;;  %v956_v0 = vld [vmem:[%s1341_s1] sm:$0xff]   ;;  %v957_v1 = vld [vmem:[%s1341_s1 + $0x8] sm:$0xff]   ;;  %v262_v40 = vlaneseq  ;;  %vm636_vm0 = vcmask 523264   ;;  %s798_s26 = sshll.u32 %s789_s19, 4  ;;  %vm705_vm1 = vcmask 7168  }
  0x32   : > { %851 = vmatprep.subr.bf16.mxu0 %v956_v0  ;;  %v958_v2 = vld [vmem:[%s1341_s1 + $0x10] sm:$0xff]   ;;  %v959_v3 = vld [vmem:[%s1341_s1 + $0x18] sm:$0xff]   ;;  %v222_v4 = vld [vmem:[%s1151_s9] sm:$0xff]  ;;  %p215_p7 = scmp.lt.s32.totalorder %s798_s26, 31 }
  0x33   : > { %852 = vmatpush3.bf16.msra.mxu0 %v956_v0  ;;  %v223_v5 = vld [vmem:[%s1151_s9 + $0x8] sm:$0xff]  ;;  %v960_v7 = vld [vmem:[%s1341_s1 + $0x20] sm:$0xff]   ;;  %v966_v11 = vld [vmem:[%s1342_s2 + $0x10] sm:$0xff]   ;;  %v1221_v41 = vshrl.u32 %v262_v40, 7 }
  0x34   : > { %853 = vmatprep.subr.bf16.mxu0 %v957_v1  ;;  %v254_v6 = vpack.c.bf16 %v223_v5, %v222_v4  ;;  %v964_v8 = vld [vmem:[%s1342_s2] sm:$0xff]   ;;  %v965_v9 = vld [vmem:[%s1342_s2 + $0x8] sm:$0xff]   ;;  %v962_v12 = vld [vmem:[%s1341_s1 + $0x30] sm:$0xff]   ;;  %s1353_s26 = smov (!%p215_p7, %s798_s26), 31 }
  0x35   : > { %v961_v10 = vld [vmem:[%s1341_s1 + $0x28] sm:$0xff]   ;;  %883 = vmatprep.subr.bf16.mxu1 %v964_v8  ;;  %v967_v13 = vld [vmem:[%s1342_s2 + $0x18] sm:$0xff]   ;;  %v968_v15 = vld [vmem:[%s1342_s2 + $0x20] sm:$0xff]   ;;  %v264_v42 = vsub.s32 0, %v1221_v41  ;;  %s799_s27 = sshll.u32 %s1353_s26, 3 }
  0x36   : > { %867 = vmatprep.mubr.bf16.mxu0 %v254_v6  ;;  %884 = vmatpush3.bf16.msra.mxu1 %v964_v8  ;;  %v963_v14 = vld [vmem:[%s1341_s1 + $0x38] sm:$0xff]   ;;  %v224_v16 = vld [vmem:[%s1151_s9 + $0x10] sm:$0xff]  ;;  %v226_v18 = vld [vmem:[%s1151_s9 + $0x20] sm:$0xff]  ;;  %s1293_s5 = scalar_lea.vmem %s1344_s4, %s799_s27 }
  0x37   : > { %854 = vmatpush3.bf16.msra.mxu0 %v957_v1  ;;  %885 = vmatprep.subr.bf16.mxu1 %v965_v9  ;;  %v225_v17 = vld [vmem:[%s1151_s9 + $0x18] sm:$0xff]  ;;  %v227_v19 = vld [vmem:[%s1151_s9 + $0x28] sm:$0xff]  ;;  %v228_v23 = vld [vmem:[%s1151_s9 + $0x30] sm:$0xff] }
  0x38   : > { %855 = vmatprep.subr.bf16.mxu0 %v958_v2  ;;  %v255_v20 = vpack.c.bf16 %v225_v17, %v224_v16  ;;  %v969_v21 = vld [vmem:[%s1342_s2 + $0x28] sm:$0xff]   ;;  %v256_v22 = vpack.c.bf16 %v227_v19, %v226_v18  ;;  %v229_v24 = vld [vmem:[%s1151_s9 + $0x38] sm:$0xff]  ;;  %v230_v25 = vld [vmem:[%s1151_s9 + $0x40] sm:$0xff] }
  0x39   : > { %v231_v26 = vld [vmem:[%s1151_s9 + $0x48] sm:$0xff]  ;;  %v257_v27 = vpack.c.bf16 %v229_v24, %v228_v23  ;;  %v232_v29 = vld [vmem:[%s1151_s9 + $0x50] sm:$0xff]  ;;  %v233_v30 = vld [vmem:[%s1151_s9 + $0x58] sm:$0xff] }
  0x3a   : > { %886 = vmatpush3.bf16.msra.mxu1 %v965_v9  ;;  %v258_v28 = vpack.c.bf16 %v231_v26, %v230_v25  ;;  %v234_v31 = vld [vmem:[%s1151_s9 + $0x60] sm:$0xff]  ;;  %v235_v32 = vld [vmem:[%s1151_s9 + $0x68] sm:$0xff]  ;;  %v259_v33 = vpack.c.bf16 %v233_v30, %v232_v29  ;;  %v236_v35 = vld [vmem:[%s1151_s9 + $0x70] sm:$0xff] }
  0x3b   : > { %856 = vmatpush3.bf16.msra.mxu0 %v958_v2  ;;  %887 = vmatprep.subr.bf16.mxu1 %v966_v11  ;;  %v260_v34 = vpack.c.bf16 %v235_v32, %v234_v31  ;;  %v237_v36 = vld [vmem:[%s1151_s9 + $0x78] sm:$0xff]  ;;  %v970_v38 = vld [vmem:[%s1342_s2 + $0x30] sm:$0xff]   ;;  %v1227_v43 = vld [vmem:[%s1343_s3] sm:$0xf] }
  0x3c   : > { %857 = vmatprep.subr.bf16.mxu0 %v959_v3  ;;  %v261_v37 = vpack.c.bf16 %v237_v36, %v236_v35  ;;  %v971_v39 = vld [vmem:[%s1342_s2 + $0x38] sm:$0xff]   ;;  %v265_v44 = vrot.slane %v1227_v43, %v264_v42 }
  0x3e   : > { %888 = vmatpush3.bf16.msra.mxu1 %v966_v11 }
  0x3f   : > { %858 = vmatpush3.bf16.msra.mxu0 %v959_v3  ;;  %889 = vmatprep.subr.bf16.mxu1 %v967_v13 }
  0x40   : > { %859 = vmatprep.subr.bf16.mxu0 %v960_v7 }
  0x42   : > { %890 = vmatpush3.bf16.msra.mxu1 %v967_v13 }
  0x43   : > { %860 = vmatpush3.bf16.msra.mxu0 %v960_v7  ;;  %891 = vmatprep.subr.bf16.mxu1 %v968_v15 }
  0x44   : > { %861 = vmatprep.subr.bf16.mxu0 %v961_v10 }
  0x46   : > { %892 = vmatpush3.bf16.msra.mxu1 %v968_v15 }
  0x47   : > { %862 = vmatpush3.bf16.msra.mxu0 %v961_v10  ;;  %893 = vmatprep.subr.bf16.mxu1 %v969_v21 }
  0x48   : > { %863 = vmatprep.subr.bf16.mxu0 %v962_v12 }
  0x4a   : > { %894 = vmatpush3.bf16.msra.mxu1 %v969_v21 }
  0x4b   : > { %864 = vmatpush3.bf16.msra.mxu0 %v962_v12  ;;  %895 = vmatprep.subr.bf16.mxu1 %v970_v38 }
  0x4c   : > { %865 = vmatprep.subr.bf16.mxu0 %v963_v14 }
  0x4e   : > { %896 = vmatpush3.bf16.msra.mxu1 %v970_v38 }
  0x4f   : > { %866 = vmatpush3.bf16.msra.mxu0 %v963_v14  ;;  %897 = vmatprep.subr.bf16.mxu1 %v971_v39 }
  0x52   : > { %868 = vmatmul.mubr.bf16.vlgmr.msra.gmra.mrb[0].mxu0 %v255_v20  ;;  %898 = vmatpush3.bf16.msra.mxu1 %v971_v39  ;;  %v618_v39 = vsub.s32 2, %v1221_v41 }
  0x53   : > { %871 = vmatprep.mubr.bf16.mxu0 %v256_v22 }
  0x5a   : > { %872 = vmatmul.mubr.bf16.gmra.mrb[4].mxu0 %v257_v27 }
  0x5b   : > { %875 = vmatprep.mubr.bf16.mxu0 %v258_v28 }
  0x62   : > { %876 = vmatmul.mubr.bf16.gmra.mrb[8].mxu0 %v259_v33 }
  0x63   : > { %879 = vmatprep.mubr.bf16.mxu0 %v260_v34 }
  0x6a   : > { %880 = vmatmul.mubr.bf16.gmra.mrb[12].mxu0 %v261_v37  ;;  %v453_v37 = vsub.s32 1, %v1221_v41 }
  0x6c   : > { %v1232_v38 = vrot.slane %v1227_v43, %v453_v37 }
 0x125   : > { %v869_v45 = vpop.f32.mrb[0].mxu0 }
 0x126   : > { %v357_v46 = vadd.f32 %v869_v45, %v265_v44  ;;  %v348_v47 = vpop.f32.mrb[1].mxu0 }
 0x127   : > { %v349_v48 = vadd.f32 %v348_v47, %v265_v44  ;;  %v870_v49 = vpop.f32.mrb[2].mxu0 }
 0x128   : > { %v360_v50 = vadd.f32 %v870_v49, %v265_v44  ;;  %v351_v51 = vpop.f32.mrb[3].mxu0  ;;  %v413_v53 = vmax.f32 %v357_v46, 0.0 }
 0x129   : > { %v352_v52 = vadd.f32 %v351_v51, %v265_v44  ;;  %v411_v55 = vmax.f32 %v349_v48, 0.0 }
 0x12a   : > { %v414_v54 = vmax.f32 %v360_v50, 0.0 }
 0x12b   : > { %v412_v56 = vmax.f32 %v352_v52, 0.0 }
 0x12c   : > { %v444_v57 = vpack.c.bf16 %v414_v54, %v413_v53 }
 0x12d   : > { %v873_v58 = vpop.f32.mrb[4].mxu0  ;;  %v443_v59 = vpack.c.bf16 %v412_v56, %v411_v55 }
 0x12e   : > { %v373_v60 = vadd.f32 %v873_v58, %v265_v44  ;;  %v364_v61 = vpop.f32.mrb[5].mxu0 }
 0x12f   : > { %v365_v62 = vadd.f32 %v364_v61, %v265_v44  ;;  %v874_v63 = vpop.f32.mrb[6].mxu0  ;;  %899 = vmatprep.mubr.bf16.mxu1 %v443_v59 }
 0x130   : > { %v376_v0 = vadd.f32 %v874_v63, %v265_v44  ;;  %v367_v1 = vpop.f32.mrb[7].mxu0  ;;  %900 = vmatmul.mubr.bf16.vlgmr.msra.gmra.mrb[0].mxu1 %v444_v57  ;;  %v417_v3 = vmax.f32 %v373_v60, 0.0 }
 0x131   : > { %v368_v2 = vadd.f32 %v367_v1, %v265_v44  ;;  %v415_v5 = vmax.f32 %v365_v62, 0.0 }
 0x132   : > { %v418_v4 = vmax.f32 %v376_v0, 0.0 }
 0x133   : > { %v416_v6 = vmax.f32 %v368_v2, 0.0 }
 0x134   : > { %v446_v7 = vpack.c.bf16 %v418_v4, %v417_v3 }
 0x135   : > { %v445_v8 = vpack.c.bf16 %v416_v6, %v415_v5  ;;  %v877_v9 = vpop.f32.mrb[8].mxu0 }
 0x136   : > { %v389_v10 = vadd.f32 %v877_v9, %v265_v44  ;;  %v380_v11 = vpop.f32.mrb[9].mxu0 }
 0x137   : > { %v381_v12 = vadd.f32 %v380_v11, %v265_v44  ;;  %v878_v13 = vpop.f32.mrb[10].mxu0  ;;  %903 = vmatprep.mubr.bf16.mxu1 %v445_v8 }
 0x138   : > { %v392_v14 = vadd.f32 %v878_v13, %v265_v44  ;;  %v383_v15 = vpop.f32.mrb[11].mxu0  ;;  %904 = vmatmul.mubr.bf16.gmra.mrb[4].mxu1 %v446_v7  ;;  %v421_v17 = vmax.f32 %v389_v10, 0.0 }
 0x139   : > { %v384_v16 = vadd.f32 %v383_v15, %v265_v44  ;;  %v419_v19 = vmax.f32 %v381_v12, 0.0 }
 0x13a   : > { %v422_v18 = vmax.f32 %v392_v14, 0.0 }
 0x13b   : > { %v420_v20 = vmax.f32 %v384_v16, 0.0 }
 0x13c   : > { %v448_v21 = vpack.c.bf16 %v422_v18, %v421_v17 }
 0x13d   : > { %v447_v22 = vpack.c.bf16 %v420_v20, %v419_v19  ;;  %v881_v23 = vpop.f32.mrb[12].mxu0 }
 0x13e   : > { %v405_v24 = vadd.f32 %v881_v23, %v265_v44  ;;  %v396_v25 = vpop.f32.mrb[13].mxu0 }
 0x13f   : > { %v397_v26 = vadd.f32 %v396_v25, %v265_v44  ;;  %v882_v27 = vpop.f32.mrb[14].mxu0  ;;  %907 = vmatprep.mubr.bf16.mxu1 %v447_v22 }
 0x140   : > { %v408_v28 = vadd.f32 %v882_v27, %v265_v44  ;;  %v399_v29 = vpop.f32.mrb[15].mxu0  ;;  %908 = vmatmul.mubr.bf16.gmra.mrb[8].mxu1 %v448_v21  ;;  %v425_v31 = vmax.f32 %v405_v24, 0.0 }
 0x141   : > { %v400_v30 = vadd.f32 %v399_v29, %v265_v44  ;;  %v423_v33 = vmax.f32 %v397_v26, 0.0  ;;  %v1237_v44 = vrot.slane %v1227_v43, %v618_v39 }
 0x142   : > { %v426_v32 = vmax.f32 %v408_v28, 0.0 }
 0x143   : > { %v424_v34 = vmax.f32 %v400_v30, 0.0 }
 0x144   : > { %v450_v35 = vpack.c.bf16 %v426_v32, %v425_v31 }
 0x145   : > { %v449_v36 = vpack.c.bf16 %v424_v34, %v423_v33 }
 0x147   : > { %911 = vmatprep.mubr.bf16.mxu1 %v449_v36 }
 0x148   : > { %912 = vmatmul.mubr.bf16.gmra.mrb[12].mxu1 %v450_v35 }
 0x203   : > { %v901_v40 = vpop.f32.mrb[0].mxu1 }
 0x204   : > { %v546_v42 = vadd.f32 %v901_v40, %v1232_v38  ;;  %v537_v45 = vpop.f32.mrb[1].mxu1 }
 0x205   : > { %v538_v46 = vadd.f32 %v537_v45, %v1232_v38  ;;  %v902_v47 = vpop.f32.mrb[2].mxu1 }
 0x206   : > { %v602_v48 = vmax.f32 %v546_v42, 0.0  ;;  %v549_v49 = vadd.f32 %v902_v47, %v1232_v38  ;;  %v540_v50 = vpop.f32.mrb[3].mxu1 }
 0x207   : > { %v600_v51 = vmax.f32 %v538_v46, 0.0  ;;  %v541_v52 = vadd.f32 %v540_v50, %v1232_v38 }
 0x208   : > { %v603_v53 = vmax.f32 %v549_v49, 0.0  ;;  %v622_v54 = vmul.f32 %v1237_v44, %v602_v48 }
 0x209   : > { %v601_v55 = vmax.f32 %v541_v52, 0.0  ;;  %v620_v56 = vmul.f32 %v1237_v44, %v600_v51 }
 0x20a   : > { %v643_v57 = vsel %vm636_vm0, %v622_v54, 0.0  ;;  %v623_v58 = vmul.f32 %v1237_v44, %v603_v53 }
 0x20b   : > { %644 = vadd.xlane.f32.xlu1 %v643_v57  ;;  %v905_v59 = vpop.f32.mrb[4].mxu1  ;;  %v637_v60 = vsel %vm636_vm0, %v620_v56, 0.0  ;;  %v621_v61 = vmul.f32 %v1237_v44, %v601_v55 }
 0x20c   : > { %v562_v62 = vadd.f32 %v905_v59, %v1232_v38  ;;  %v553_v63 = vpop.f32.mrb[5].mxu1  ;;  %638 = vadd.xlane.f32.xlu0 %v637_v60  ;;  %v646_v5 = vsel %vm636_vm0, %v623_v58, 0.0 }
 0x20d   : > { %v554_v0 = vadd.f32 %v553_v63, %v1232_v38  ;;  %v906_v1 = vpop.f32.mrb[6].mxu1  ;;  %v640_v8 = vsel %vm636_vm0, %v621_v61, 0.0 }
 0x20e   : > { %v606_v2 = vmax.f32 %v562_v62, 0.0  ;;  %v565_v3 = vadd.f32 %v906_v1, %v1232_v38  ;;  %v556_v4 = vpop.f32.mrb[7].mxu1  ;;  %v687_v62 = vsub.s32 3, %v1221_v41 }
 0x20f   : > { %v604_v6 = vmax.f32 %v554_v0, 0.0  ;;  %v557_v7 = vadd.f32 %v556_v4, %v1232_v38  ;;  %647 = vadd.xlane.f32.xlu1 %v646_v5 }
 0x210   : > { %v607_v9 = vmax.f32 %v565_v3, 0.0  ;;  %641 = vadd.xlane.f32.xlu0 %v640_v8  ;;  %v626_v10 = vmul.f32 %v1237_v44, %v606_v2  ;;  %v688_v63 = vrot.slane %v1227_v43, %v687_v62 }
 0x211   : > { %v605_v11 = vmax.f32 %v557_v7, 0.0  ;;  %v624_v15 = vmul.f32 %v1237_v44, %v604_v6 }
 0x212   : > { %v655_v12 = vsel %vm636_vm0, %v626_v10, 0.0  ;;  %v627_v13 = vmul.f32 %v1237_v44, %v607_v9 }
 0x213   : > { %v909_v14 = vpop.f32.mrb[8].mxu1  ;;  %v625_v19 = vmul.f32 %v1237_v44, %v605_v11  ;;  %v649_v27 = vsel %vm636_vm0, %v624_v15, 0.0 }
 0x214   : > { %v578_v16 = vadd.f32 %v909_v14, %v1232_v38  ;;  %v569_v17 = vpop.f32.mrb[9].mxu1  ;;  %656 = vadd.xlane.f32.xlu0 %v655_v12  ;;  %v658_v18 = vsel %vm636_vm0, %v627_v13, 0.0 }
 0x215   : > { %v570_v20 = vadd.f32 %v569_v17, %v1232_v38  ;;  %659 = vadd.xlane.f32.xlu1 %v658_v18  ;;  %v910_v21 = vpop.f32.mrb[10].mxu1  ;;  %v652_v29 = vsel %vm636_vm0, %v625_v19, 0.0 }
 0x216   : > { %v610_v22 = vmax.f32 %v578_v16, 0.0  ;;  %v581_v23 = vadd.f32 %v910_v21, %v1232_v38  ;;  %v572_v24 = vpop.f32.mrb[11].mxu1 }
 0x217   : > { %v608_v25 = vmax.f32 %v570_v20, 0.0  ;;  %v573_v26 = vadd.f32 %v572_v24, %v1232_v38 }
 0x218   : > { %v611_v28 = vmax.f32 %v581_v23, 0.0  ;;  %650 = vadd.xlane.f32.xlu0 %v649_v27  ;;  %v630_v30 = vmul.f32 %v1237_v44, %v610_v22 }
 0x219   : > { %v609_v31 = vmax.f32 %v573_v26, 0.0  ;;  %653 = vadd.xlane.f32.xlu1 %v652_v29  ;;  %v628_v35 = vmul.f32 %v1237_v44, %v608_v25 }
 0x21a   : > { %v667_v32 = vsel %vm636_vm0, %v630_v30, 0.0  ;;  %v631_v33 = vmul.f32 %v1237_v44, %v611_v28 }
 0x21b   : > { %v913_v34 = vpop.f32.mrb[12].mxu1  ;;  %v629_v40 = vmul.f32 %v1237_v44, %v609_v31  ;;  %v661_v51 = vsel %vm636_vm0, %v628_v35, 0.0 }
 0x21c   : > { %v594_v36 = vadd.f32 %v913_v34, %v1232_v38  ;;  %v585_v37 = vpop.f32.mrb[13].mxu1  ;;  %668 = vadd.xlane.f32.xlu0 %v667_v32  ;;  %v670_v39 = vsel %vm636_vm0, %v631_v33, 0.0 }
 0x21d   : > { %v586_v42 = vadd.f32 %v585_v37, %v1232_v38  ;;  %v914_v45 = vpop.f32.mrb[14].mxu1  ;;  %671 = vadd.xlane.f32.xlu1 %v670_v39  ;;  %v664_v52 = vsel %vm636_vm0, %v629_v40, 0.0 }
 0x21e   : > { %v597_v46 = vadd.f32 %v914_v45, %v1232_v38  ;;  %v588_v47 = vpop.f32.mrb[15].mxu1  ;;  %v614_v48 = vmax.f32 %v594_v36, 0.0 }
 0x21f   : > { %v612_v49 = vmax.f32 %v586_v42, 0.0  ;;  %v589_v50 = vadd.f32 %v588_v47, %v1232_v38 }
 0x220   : > { %662 = vadd.xlane.f32.xlu0 %v661_v51  ;;  %v615_v53 = vmax.f32 %v597_v46, 0.0  ;;  %v634_v58 = vmul.f32 %v1237_v44, %v614_v48 }
 0x221   : > { %v613_v54 = vmax.f32 %v589_v50, 0.0  ;;  %665 = vadd.xlane.f32.xlu1 %v664_v52  ;;  %v632_v55 = vmul.f32 %v1237_v44, %v612_v49 }
 0x222   : > { %v635_v59 = vmul.f32 %v1237_v44, %v615_v53  ;;  %v679_v60 = vsel %vm636_vm0, %v634_v58, 0.0 }
 0x223   : > { %v673_v56 = vsel %vm636_vm0, %v632_v55, 0.0  ;;  %v633_v57 = vmul.f32 %v1237_v44, %v613_v54 }
 0x224   : > { %674 = vadd.xlane.f32.xlu0 %v673_v56  ;;  %v682_v61 = vsel %vm636_vm0, %v635_v59, 0.0 }
 0x225   : > { %v676_v38 = vsel %vm636_vm0, %v633_v57, 0.0 }
 0x226   : > { %677 = vadd.xlane.f32.xlu1 %v676_v38 }
 0x228   : > { %680 = vadd.xlane.f32.xlu0 %v679_v60 }
 0x22a   : > { %683 = vadd.xlane.f32.xlu1 %v682_v61 }
 0x298   : > { %v645_v44 = vpop.xlane.xlu1 %644 }
 0x299   : > { %v691_v0 = vadd.f32 %v688_v63, %v645_v44  ;;  %v639_v1 = vpop.xlane.xlu0 %638 }
 0x29a   : > { %v689_v2 = vadd.f32 %v688_v63, %v639_v1 }
 0x29b   : > { %708 = vst.msk [vmem:[%s1293_s5 + $0x10] sm:$0xff] %vm705_vm1, %v691_v0 }
 0x29c   : > { %706 = vst.msk [vmem:[%s1293_s5] sm:$0xff] %vm705_vm1, %v689_v2  ;;  %v648_v41 = vpop.xlane.xlu1 %647 }
 0x29d   : > { %v692_v43 = vadd.f32 %v688_v63, %v648_v41  ;;  %v642_v3 = vpop.xlane.xlu0 %641 }
 0x29e   : > { %v690_v4 = vadd.f32 %v688_v63, %v642_v3 }
 0x29f   : > { %709 = vst.msk [vmem:[%s1293_s5 + $0x18] sm:$0xff] %vm705_vm1, %v692_v43 }
 0x2a0   : > { %707 = vst.msk [vmem:[%s1293_s5 + $0x8] sm:$0xff] %vm705_vm1, %v690_v4 }
 0x2a1   : > { %v657_v5 = vpop.xlane.xlu0 %656 }
 0x2a2   : > { %v695_v6 = vadd.f32 %v688_v63, %v657_v5  ;;  %v660_v7 = vpop.xlane.xlu1 %659 }
 0x2a3   : > { %v696_v8 = vadd.f32 %v688_v63, %v660_v7 }
 0x2a4   : > { %712 = vst.msk [vmem:[%s1293_s5 + $0x30] sm:$0xff] %vm705_vm1, %v695_v6 }
 0x2a5   : > { %713 = vst.msk [vmem:[%s1293_s5 + $0x38] sm:$0xff] %vm705_vm1, %v696_v8  ;;  %v651_v9 = vpop.xlane.xlu0 %650 }
 0x2a6   : > { %v693_v10 = vadd.f32 %v688_v63, %v651_v9  ;;  %v654_v11 = vpop.xlane.xlu1 %653 }
 0x2a7   : > { %v694_v12 = vadd.f32 %v688_v63, %v654_v11 }
 0x2a8   : > { %710 = vst.msk [vmem:[%s1293_s5 + $0x20] sm:$0xff] %vm705_vm1, %v693_v10 }
 0x2a9   : > { %711 = vst.msk [vmem:[%s1293_s5 + $0x28] sm:$0xff] %vm705_vm1, %v694_v12  ;;  %v669_v13 = vpop.xlane.xlu0 %668 }
 0x2aa   : > { %v699_v14 = vadd.f32 %v688_v63, %v669_v13  ;;  %v672_v15 = vpop.xlane.xlu1 %671 }
 0x2ab   : > { %v700_v16 = vadd.f32 %v688_v63, %v672_v15 }
 0x2ac   : > { %716 = vst.msk [vmem:[%s1293_s5 + $0x50] sm:$0xff] %vm705_vm1, %v699_v14 }
 0x2ad   : > { %717 = vst.msk [vmem:[%s1293_s5 + $0x58] sm:$0xff] %vm705_vm1, %v700_v16  ;;  %v663_v17 = vpop.xlane.xlu0 %662 }
 0x2ae   : > { %v697_v18 = vadd.f32 %v688_v63, %v663_v17  ;;  %v666_v19 = vpop.xlane.xlu1 %665 }
 0x2af   : > { %v698_v20 = vadd.f32 %v688_v63, %v666_v19 }
 0x2b0   : > { %714 = vst.msk [vmem:[%s1293_s5 + $0x40] sm:$0xff] %vm705_vm1, %v697_v18 }
 0x2b1   : > { %715 = vst.msk [vmem:[%s1293_s5 + $0x48] sm:$0xff] %vm705_vm1, %v698_v20  ;;  %v675_v21 = vpop.xlane.xlu0 %674 }
 0x2b2   : > { %v701_v22 = vadd.f32 %v688_v63, %v675_v21 }
 0x2b3   : > { %v678_v23 = vpop.xlane.xlu1 %677 }
 0x2b4   : > { %718 = vst.msk [vmem:[%s1293_s5 + $0x60] sm:$0xff] %vm705_vm1, %v701_v22  ;;  %v702_v24 = vadd.f32 %v688_v63, %v678_v23 }
 0x2b5   : > { %v681_v25 = vpop.xlane.xlu0 %680 }
 0x2b6   : > { %719 = vst.msk [vmem:[%s1293_s5 + $0x68] sm:$0xff] %vm705_vm1, %v702_v24  ;;  %v703_v26 = vadd.f32 %v688_v63, %v681_v25 }
 0x2b7   : > { %v684_v27 = vpop.xlane.xlu1 %683 }
 0x2b8   : > { %720 = vst.msk [vmem:[%s1293_s5 + $0x70] sm:$0xff] %vm705_vm1, %v703_v26  ;;  %v704_v28 = vadd.f32 %v688_v63, %v684_v27 }
 0x2ba   : > { %721 = vst.msk [vmem:[%s1293_s5 + $0x78] sm:$0xff] %vm705_vm1, %v704_v28 }
 0x2bb PF: > { %p14_p8 = scmp.ge.s32.totalorder %s1086_s20, 4   ;;  %s1348_s15 = smov %s1028_s16 }
 0x2bc   : > { %s1349_s16 = smov %s1032_s17  ;;  %s1350_s17 = smov %s1096_s23 }
 0x2bd   : > { %s1351_s18 = smov %s1086_s20  ;;  %16 = sbr.rel (!%p14_p8) target bundleno = 3 (0x3), region = 76 }
 0x2c4   :  { %744 = vsyncpa [#allocation3], 1 }
 0x2c5   :  { %746 = vsyncpa [#allocation3 + $0x1], 1 }

</bundles_post_ra>
